<compile_context>
chip_gen: v7x
topology: tpu7x:2x2x1
jax: 0.10.0
libtpu: 0.0.40
codegen_flags: <defaults>
</compile_context>

<pallas_src>
import math
import operator

import jax
import jax.numpy as jnp
from jax.experimental import pallas as pl
from jax.experimental.pallas import tpu as pltpu

_LANE = 128
_TARGET_BLOCK_BYTES = 2 << 20          # ~2 MiB per stream per block
_TILED_MIN_ELEMS = 512 * 1024          # below this, one full block suffices
_PAD_COLS = 512                        # lane-dense width for the ragged fallback

_LIFTED_TENSOR = jnp.array([[1.0, 2.0], [3.0, 4.0]], dtype=jnp.float32)


def _make_kernel(op):
    """Binary elementwise kernel: o = op(a, b) on the current VMEM tile.

    `a` may be a small (1, C) / (1, 1) block that broadcasts against the
    (tr, C) block of `b` (or vice versa); the cast to the output dtype
    happens here so the wrapper never materializes an upcast copy in HBM.
    """

    def kernel(a_ref, b_ref, o_ref):
        o_ref[...] = op(a_ref[...], b_ref[...]).astype(o_ref.dtype)

    return kernel


def _sublane_for(*dtypes):
    """Minimum sublane multiple for the narrowest dtype among `dtypes`."""
    itemsize = min(jnp.dtype(d).itemsize for d in dtypes)
    return max(8, 32 // itemsize)


def _row_invariant(shape, out_shape):
    """True if `shape` broadcast against `out_shape` varies only in the last dim."""
    if not shape:
        return True
    for i, d in enumerate(reversed(shape)):
        if i == 0:
            if d not in (1, out_shape[-1]):
                return False
        elif d != 1:
            return False
    return True


def _as_small_2d(t):
    """Reshape a row-invariant operand to (1, last_dim) (or (1, 1) for scalars)."""
    last = t.shape[-1] if t.ndim else 1
    return t.reshape(1, last)


def _elementwise_small(op, a, b, out_shape, out_dtype):
    """Tiny case: whole array as a single VMEM block (block == full dims).

    Launch-overhead bound for the module's real (2, 2) operands; intentionally
    not tuned (see perf review)."""
    a2 = jnp.broadcast_to(a, out_shape)
    b2 = jnp.broadcast_to(b, out_shape)
    if len(out_shape) < 2:
        a2 = a2.reshape(1, -1)
        b2 = b2.reshape(1, -1)
    shape2 = a2.shape
    nd = len(shape2)
    out = pl.pallas_call(
        _make_kernel(op),
        out_shape=jax.ShapeDtypeStruct(shape2, out_dtype),
        grid=(1,),
        in_specs=[
            pl.BlockSpec(shape2, lambda i, nd=nd: (0,) * nd),
            pl.BlockSpec(shape2, lambda i, nd=nd: (0,) * nd),
        ],
        out_specs=pl.BlockSpec(shape2, lambda i, nd=nd: (0,) * nd),
    )(a2, b2)
    return out.reshape(out_shape)


def _elementwise_tiled_rows(op, a2, b2, out_dtype, small=None):
    """2-D row-tiled elementwise op, pipelined over a single 'parallel' grid axis.

    `small` in {None, 'a', 'b'}: which operand (if any) is a tiny,
    row-invariant (1, C) / (1, 1) block.  It is fetched once (constant
    index_map) and broadcast inside the kernel instead of being materialized
    at full size, saving one full HBM read stream.

    The last grid block may be partial; Pallas masks the output writes.  The
    out-of-bounds input rows read into VMEM are unspecified (may yield
    NaN/Inf with truediv) but are discarded — do not rely on those lanes.
    """
    big = b2 if small == 'a' else a2
    R, C = big.shape

    tiled_dtypes = [jnp.dtype(out_dtype)]
    if small != 'a':
        tiled_dtypes.append(a2.dtype)
    if small != 'b':
        tiled_dtypes.append(b2.dtype)
    sub = _sublane_for(*tiled_dtypes)

    tr = _TARGET_BLOCK_BYTES // (C * jnp.dtype(out_dtype).itemsize)
    tr = max(sub, (tr // sub) * sub)
    tr = min(tr, R)                       # tr == R (full dim) for short arrays
    grid = (pl.cdiv(R, tr),)

    big_spec = pl.BlockSpec((tr, C), lambda i: (i, 0))
    a_spec = pl.BlockSpec(a2.shape, lambda i: (0, 0)) if small == 'a' else big_spec
    b_spec = pl.BlockSpec(b2.shape, lambda i: (0, 0)) if small == 'b' else big_spec

    return pl.pallas_call(
        _make_kernel(op),
        out_shape=jax.ShapeDtypeStruct((R, C), out_dtype),
        grid=grid,
        in_specs=[a_spec, b_spec],
        out_specs=big_spec,
        compiler_params=pltpu.CompilerParams(
            dimension_semantics=("parallel",),   # lets v7x split across both TCs
            vmem_limit_bytes=32 << 20,           # headroom incl. v5e's 16 MiB default
        ),
    )(a2, b2)


def _elementwise_padded(op, a, b, out_dtype):
    """Ragged fallback: flatten, pad to a lane-dense width, tile, slice tail off.

    The divisor is padded with 1.0 so the discarded tail never produces
    NaN/Inf intermediates."""
    n = a.size
    a_f = a.reshape(-1)
    b_f = b.reshape(-1)
    pad = (-n) % _PAD_COLS
    if pad:
        a_f = jnp.pad(a_f, (0, pad))                        # numerator tail = 0
        b_f = jnp.pad(b_f, (0, pad), constant_values=1)     # divisor tail = 1
    rows = (n + pad) // _PAD_COLS
    out = _elementwise_tiled_rows(
        op, a_f.reshape(rows, _PAD_COLS), b_f.reshape(rows, _PAD_COLS),
        out_dtype, small=None)
    return out.reshape(-1)[:n].reshape(a.shape)


def _binary_elementwise(op, a, b):
    """op(a, b) with numpy-style broadcasting, computed in a Pallas kernel."""
    a = jnp.asarray(a)
    b = jnp.asarray(b)
    out_shape = jnp.broadcast_shapes(a.shape, b.shape)
    out_dtype = jnp.result_type(a.dtype, b.dtype)
    if op is operator.truediv and not jnp.issubdtype(out_dtype, jnp.floating):
        out_dtype = jnp.float32     # true-division always yields a float
    n = math.prod(out_shape) if out_shape else 1

    if n < _TILED_MIN_ELEMS:
        return _elementwise_small(op, a, b, out_shape, out_dtype)

    C = out_shape[-1]
    out_itemsize = jnp.dtype(out_dtype).itemsize
    tileable = (len(out_shape) >= 2
                and C % _LANE == 0
                and C * out_itemsize * 8 <= _TARGET_BLOCK_BYTES)

    if tileable:
        R = n // C
        # Small, row-invariant LHS (the lifted-tensor-broadcast case): keep it
        # as a resident (1, C) block, don't materialize the broadcast.
        if (b.shape == out_shape and a.shape != out_shape
                and _row_invariant(a.shape, out_shape)):
            out = _elementwise_tiled_rows(op, _as_small_2d(a), b.reshape(R, C),
                                          out_dtype, small='a')
            return out.reshape(out_shape)
        if (a.shape == out_shape and b.shape != out_shape
                and _row_invariant(b.shape, out_shape)):
            out = _elementwise_tiled_rows(op, a.reshape(R, C), _as_small_2d(b),
                                          out_dtype, small='b')
            return out.reshape(out_shape)
        if a.shape == out_shape and b.shape == out_shape:
            out = _elementwise_tiled_rows(op, a.reshape(R, C), b.reshape(R, C),
                                          out_dtype, small=None)
            return out.reshape(out_shape)

    # General broadcast pattern or ragged last dim: materialize + padded tiling.
    a_full = jnp.broadcast_to(a, out_shape)
    b_full = jnp.broadcast_to(b, out_shape)
    return _elementwise_padded(op, a_full, b_full, out_dtype)


def lifted_tensor_forward(op, x, length):
    """Pallas equivalent of LiftedTensor(op).forward(x, length).

    `length` must be a static python int (as in the reference test data).
    """
    sliced = _LIFTED_TENSOR[:, :length]
    return _binary_elementwise(op, sliced, x)


if __name__ == "__main__":
    key = jax.random.PRNGKey(0)
    k0, k1, k2, k3, k4, k5 = jax.random.split(key, 6)

    # 1) Mirror LiftedTensor.test_data: (op, (x, length)) with x of shape (2, 2).
    test_data = [
        (operator.add, jax.random.normal(k0, (2, 2), jnp.float32), 2),
        (operator.truediv, jnp.ones((2, 2), jnp.float32), 2),
        (operator.mul, jax.random.normal(k1, (2, 2), jnp.float32), 2),
        (operator.sub, jax.random.uniform(k2, (2, 2), jnp.float32), 2),
    ]
    for op, x, length in test_data:
        out = jax.block_until_ready(lifted_tensor_forward(op, x, length))
        ref = op(_LIFTED_TENSOR[:, :length], x)
        assert out.shape == ref.shape, (op, out.shape, ref.shape)
        assert out.dtype == ref.dtype, (op, out.dtype, ref.dtype)
        assert jnp.allclose(out, ref, atol=1e-6, rtol=1e-6), (op, out, ref)

    # 2) Tiled, pipelined path: same-shape big operands (2 reads + 1 write).
    a_big = jax.random.normal(k3, (2048, 1024), jnp.float32)
    b_big = jax.random.uniform(k4, (2048, 1024), jnp.float32,
                               minval=0.5, maxval=1.5)
    for op in (operator.add, operator.truediv, operator.mul, operator.sub):
        out = jax.block_until_ready(_binary_elementwise(op, a_big, b_big))
        assert jnp.allclose(out, op(a_big, b_big), atol=1e-5, rtol=1e-5), op

    # 3) Tiled path with a small row-invariant LHS (lifted-tensor-style
    #    broadcast): only one full-size read stream.
    lhs_small = jax.random.uniform(k5, (1024,), jnp.float32,
                                   minval=0.5, maxval=1.5)
    for op in (operator.add, operator.truediv, operator.sub):
        out = jax.block_until_ready(_binary_elementwise(op, lhs_small, b_big))
        assert jnp.allclose(out, op(lhs_small, b_big), atol=1e-5, rtol=1e-5), op

    # 4) Ragged fallback (last dim not a multiple of 128): divisor padded with
    #    1.0 so the discarded tail stays finite.
    a_r = jax.random.normal(k3, (1025, 1000), jnp.float32)
    b_r = jax.random.uniform(k4, (1025, 1000), jnp.float32,
                              minval=0.5, maxval=1.5)
    out = jax.block_until_ready(_binary_elementwise(operator.truediv, a_r, b_r))
    assert jnp.allclose(out, a_r / b_r, atol=1e-5, rtol=1e-5)

    print("KERNEL_OK")
</pallas_src>

<mosaic_0001>
module attributes {stable_mosaic.version = 11 : i64} {
  func.func @kernel(%arg0: i32, %arg1: memref<2x2xf32, #tpu.memory_space<vmem>>, %arg2: memref<2x2xf32, #tpu.memory_space<vmem>>, %arg3: memref<2x2xf32, #tpu.memory_space<vmem>>) attributes {dimension_semantics = [#tpu.dimension_semantics<arbitrary>], iteration_bounds = array<i64: 1>, scalar_prefetch = 0 : i64, scratch_operands = 0 : i64, tpu.core_type = #tpu.core_type<tc>, window_params = [{pipeline_mode = #tpu.pipeline_mode<synchronous>, transform_indices = @transform_0, window_bounds = array<i64: 2, 2>}, {pipeline_mode = #tpu.pipeline_mode<synchronous>, transform_indices = @transform_1, window_bounds = array<i64: 2, 2>}, {pipeline_mode = #tpu.pipeline_mode<synchronous>, transform_indices = @transform_2, window_bounds = array<i64: 2, 2>}]} {
    %c0 = arith.constant 0 : index
    %c0_0 = arith.constant 0 : index
    %0 = vector.load %arg1[%c0, %c0_0] : memref<2x2xf32, #tpu.memory_space<vmem>>, vector<2x2xf32>
    %c0_1 = arith.constant 0 : index
    %c0_2 = arith.constant 0 : index
    %1 = vector.load %arg2[%c0_1, %c0_2] : memref<2x2xf32, #tpu.memory_space<vmem>>, vector<2x2xf32>
    %2 = arith.addf %0, %1 : vector<2x2xf32>
    %c0_3 = arith.constant 0 : index
    %c0_4 = arith.constant 0 : index
    %3 = vector.load %arg3[%c0_3, %c0_4] : memref<2x2xf32, #tpu.memory_space<vmem>>, vector<2x2xf32>
    tpu.vector_store %arg3[%c0_3, %c0_4], %2 {strides = array<i32>} : memref<2x2xf32, #tpu.memory_space<vmem>>, vector<2x2xf32>,
    return
  }
  func.func @transform_0(%arg0: i32) -> (i32, i32) {
    %c0_i32 = arith.constant 0 : i32
    %c0_i32_0 = arith.constant 0 : i32
    %c0_i32_1 = arith.constant 0 : i32
    return %c0_i32, %c0_i32_0 : i32, i32
  }
  func.func @transform_1(%arg0: i32) -> (i32, i32) {
    %c0_i32 = arith.constant 0 : i32
    %c0_i32_0 = arith.constant 0 : i32
    %c0_i32_1 = arith.constant 0 : i32
    return %c0_i32, %c0_i32_0 : i32, i32
  }
  func.func @transform_2(%arg0: i32) -> (i32, i32) {
    %c0_i32 = arith.constant 0 : i32
    %c0_i32_0 = arith.constant 0 : i32
    %c0_i32_1 = arith.constant 0 : i32
    return %c0_i32, %c0_i32_0 : i32, i32
  }
}

</mosaic_0001>

<bundles_post_ra>
// kernel: tpu_custom_call.1
= control target key start
LH: loop header
LB: loop body
LE: loop exit
PB: predicated region body
PF: predicated region fallthrough
CT: control target
= control target key end

     0   :  { %7 = vsyncpa [#allocation3], 0  ;;  %s138_s0 = inlined_call_operand.hbm [shape: f32[2,2], index: 0, kind: input, shape index: {}]   ;;  %s139_s1 = inlined_call_operand.vmem [shape: f32[2,2], index: 1, kind: input, shape index: {}]   ;;  %s140_s2 = inlined_call_operand.hbm [shape: f32[2,2], index: 2, kind: output, shape index: {}]  }
   0x1   :  { %8 = vsyncpa [#allocation4], 0  ;;  %s94_s9 = smov [#allocation2]   ;;  %s46_s13 = scalar_lea.hbm %s138_s0, 32 }
   0x2   :  { %s15_s10 = sshll.u32 %s94_s9, 4  ;;  %p47_p0 = scmp.ne.s32.totalorder %s138_s0, %s46_s13  ;;  %s16_s10 = int_to_ptr.vmem [resolvable:$true] %s15_s10 }
   0x3   :  { %p50_p1 = scmp.lt.u32.totalorder %s46_s13, %s138_s0 }
   0x5   :  { %p52_p2 = pnand %p50_p1, %p47_p0 }
   0x7   :  { %55 = shalt.err (!%p52_p2)
}
   0x8   :  { %s56_s18 = scalar_lea.vmem %s16_s10, 32  ;;  %p61_p4 = scmp.lt.s32.totalorder %s16_s10, %s16_s10 }
   0x9   :  { %p57_p3 = scmp.ne.s32.totalorder %s16_s10, %s56_s18  ;;  %p62_p5 = scmp.lt.s32.totalorder %s56_s18, %s56_s18 }
   0xb   :  { %p63_p6 = por %p62_p5, %p61_p4 }
   0xd   :  { %p64_p7 = pnand %p63_p6, %p57_p3 }
   0xf   :  { %67 = shalt.err (!%p64_p7)
}
  0x10   :  { %18 = dma.hbm_to_vmem [thread:$0]  %s138_s0, 32, %s16_s10, [#allocation3]  }
  0x11   :  { %90 = dma.done.wait [#allocation3], 32  }
  0x12   :  { %91 = vsyncadd [#allocation3], 4294967264  ;;  %s95_s21 = smov [#allocation5]   ;;  %v24_v0 = vld [vmem:[#allocation2] sm:$0x3]  ;;  %vm27_vm0 = vcmask 9216  }
  0x13   :  { %s35_s22 = sshll.u32 %s95_s21, 4  ;;  %v25_v1 = vld [vmem:[%s139_s1] sm:$0x3]  ;;  %s36_s22 = int_to_ptr.vmem [resolvable:$true] %s35_s22 }
  0x14   :  { %v26_v2 = vadd.f32 %v25_v1, %v24_v0  ;;  %s68_s25 = scalar_lea.vmem %s36_s22, 32  ;;  %p73_p9 = scmp.lt.s32.totalorder %s36_s22, %s36_s22 }
  0x15   :  { %p69_p8 = scmp.ne.s32.totalorder %s36_s22, %s68_s25  ;;  %p74_p10 = scmp.lt.s32.totalorder %s68_s25, %s68_s25 }
  0x16   :  { %28 = vst.msk [vmem:[#allocation5] sm:$0x3] %vm27_vm0, %v26_v2 }
  0x17   :  { %p75_p11 = por %p74_p10, %p73_p9 }
  0x19   :  { %p76_p12 = pnand %p75_p11, %p69_p8 }
  0x1b   :  { %79 = shalt.err (!%p76_p12)
}
  0x1c   :  { %s80_s27 = scalar_lea.hbm %s140_s2, 32 }
  0x1d   :  { %p81_p13 = scmp.ne.s32.totalorder %s140_s2, %s80_s27  ;;  %p84_p0 = scmp.lt.u32.totalorder %s80_s27, %s140_s2 }
  0x1f   :  { %p86_p1 = pnand %p84_p0, %p81_p13 }
  0x21   :  { %89 = shalt.err (!%p86_p1)
}
  0x22   :  { %38 = dma.vmem_to_hbm [thread:$0]  %s36_s22, 32, %s140_s2, [#allocation4]  }
  0x23   :  { %92 = dma.done.wait [#allocation4], 32  }
  0x24   :  { %93 = vsyncadd [#allocation4], 4294967264 }
  0x25   :  { %42 = vsyncpa [#allocation3], 1 }
  0x26   :  { %43 = vsyncpa [#allocation4], 1 }

</bundles_post_ra>
